<compile_context>
chip_gen: v7x
topology: tpu7x:2x2x1
jax: 0.10.0
libtpu: 0.0.40
codegen_flags: <defaults>
</compile_context>

<pallas_src>
import functools
import math

import jax
import jax.numpy as jnp
from jax.experimental import pallas as pl
from jax.experimental.pallas import tpu as pltpu


def _round_up(x: int, m: int) -> int:
    return ((x + m - 1) // m) * m


# ----------------------------------------------------------------------------
# Fused MLP kernel: chain of (matmul + bias [+ SiLU]) over a batch tile.
# ----------------------------------------------------------------------------
def _mlp_fused_kernel(*refs, num_layers: int):
    # refs = (x_ref, w0, b0, w1, b1, ..., w_{L-1}, b_{L-1}, o_ref)
    x_ref = refs[0]
    o_ref = refs[-1]
    wb_refs = refs[1:-1]

    h = x_ref[...].astype(jnp.float32)           # (tile_m, K0_pad)
    for li in range(num_layers):                 # static Python unroll
        w = wb_refs[2 * li][...]                 # (K_pad, N_pad), VMEM-resident
        b = wb_refs[2 * li + 1][...]             # (1, N_pad)
        h = jnp.dot(h, w, preferred_element_type=jnp.float32) + b  # MXU
        if li < num_layers - 1:
            # SiLU(y) = y * sigmoid(y); sigmoid -> EUP slot (free next to MXU).
            h = h * jax.nn.sigmoid(h)
    o_ref[...] = h.astype(o_ref.dtype)


# ----------------------------------------------------------------------------
# Wrapper: pad to lane-dense shapes, build specs, single pallas_call.
# ----------------------------------------------------------------------------
def mlp_forward(params, x, *, max_tile_m: int = 256):
    """Fused MLP forward.  params: list of (w [K,N], b [N]).  x: [M, K0]."""
    M, K0 = x.shape
    num_layers = len(params)

    # Layer dims and their 128-lane padded versions.
    dims = [K0] + [w.shape[1] for (w, _) in params]
    pdims = [_round_up(d, 128) for d in dims]

    # Zero-pad activations / weights / biases (inert for the math, see header).
    xp = jnp.pad(x.astype(jnp.float32), ((0, 0), (0, pdims[0] - K0)))
    wb_padded = []
    for li, (w, b) in enumerate(params):
        k_in, k_out = w.shape
        wp = jnp.pad(w.astype(jnp.float32),
                     ((0, pdims[li] - k_in), (0, pdims[li + 1] - k_out)))
        bp = jnp.pad(b.astype(jnp.float32),
                     (0, pdims[li + 1] - k_out)).reshape(1, pdims[li + 1])
        wb_padded += [wp, bp]

    # Large batch tile (multiple of 8), clamped so a tiny batch stays one step.
    tile_m = min(max_tile_m, _round_up(M, 8))
    grid_m = pl.cdiv(M, tile_m)

    # Block specs: x / out tiled over batch; weights & biases full, resident.
    in_specs = [pl.BlockSpec((tile_m, pdims[0]), lambda i: (i, 0))]
    for li in range(num_layers):
        p_in, p_out = pdims[li], pdims[li + 1]
        in_specs.append(
            pl.BlockSpec((p_in, p_out), lambda i: (0, 0)))   # full weight
        in_specs.append(
            pl.BlockSpec((1, p_out), lambda i: (0, 0)))      # bias row
    out_specs = pl.BlockSpec((tile_m, pdims[-1]), lambda i: (i, 0))

    # Cost estimate (padded sizes): helps XLA schedule around the custom call.
    flops = sum(2 * M * pdims[li] * pdims[li + 1] for li in range(num_layers))
    transcendentals = sum(M * pdims[li + 1] for li in range(num_layers - 1))
    bytes_accessed = 4 * (M * pdims[0] + M * pdims[-1]
                          + sum(int(a.size) for a in wb_padded))
    cost = pl.CostEstimate(flops=flops, transcendentals=transcendentals,
                           bytes_accessed=bytes_accessed)

    # VMEM budget: double-buffered x / out tiles + all resident params, with
    # generous headroom, but well under the v7x 64 MiB physical cap.
    param_bytes = 4 * sum(int(a.size) for a in wb_padded)
    tile_bytes = 4 * tile_m * (pdims[0] + pdims[-1])
    vmem_limit = max(4 * (2 * tile_bytes + 2 * param_bytes), 16 * 1024 * 1024)
    vmem_limit = min(vmem_limit, 48 * 1024 * 1024)

    kernel = functools.partial(_mlp_fused_kernel, num_layers=num_layers)

    out_padded = pl.pallas_call(
        kernel,
        out_shape=jax.ShapeDtypeStruct((M, pdims[-1]), jnp.float32),
        grid_spec=pltpu.PrefetchScalarGridSpec(
            num_scalar_prefetch=0,
            grid=(grid_m,),
            in_specs=in_specs,
            out_specs=out_specs,
        ),
        compiler_params=pltpu.CompilerParams(
            dimension_semantics=("parallel",),
            vmem_limit_bytes=int(vmem_limit),
        ),
        cost_estimate=cost,
    )(xp, *wb_padded)

    # Slice the lane padding off the final output.
    return out_padded[:, :dims[-1]]


# ----------------------------------------------------------------------------
# Parameter construction + pure-JAX reference.
# ----------------------------------------------------------------------------
def init_mlp_params(key, input_dim, hidden_dims, output_dim):
    """Mimics nn.Linear default init (uniform +/- 1/sqrt(fan_in)).
    Weights stored pre-transposed as [in_dim, out_dim] so kernel does x @ W + b."""
    dims = [input_dim] + list(hidden_dims) + [output_dim]
    params = []
    for in_dim, out_dim in zip(dims[:-1], dims[1:]):
        key, kw, kb = jax.random.split(key, 3)
        bound = 1.0 / math.sqrt(in_dim)
        w = jax.random.uniform(kw, (in_dim, out_dim), jnp.float32, -bound, bound)
        b = jax.random.uniform(kb, (out_dim,), jnp.float32, -bound, bound)
        params.append((w, b))
    return params


def mlp_reference(params, x):
    n = len(params)
    for i, (w, b) in enumerate(params):
        x = x @ w + b
        if i < n - 1:
            x = x * jax.nn.sigmoid(x)
    return x


if __name__ == "__main__":
    input_dim = 16
    hidden_dims = (32, 32)
    output_dim = 8
    batch = 64

    key = jax.random.PRNGKey(0)
    kx, kp = jax.random.split(key)
    x = jax.random.normal(kx, (batch, input_dim), dtype=jnp.float32)
    params = init_mlp_params(kp, input_dim, hidden_dims, output_dim)

    out = mlp_forward(params, x)
    out = jax.block_until_ready(out)

    ref = mlp_reference(params, x)
    assert out.shape == (batch, output_dim), out.shape
    assert jnp.allclose(out, ref, atol=1e-5, rtol=1e-5), "mismatch vs reference"

    print("KERNEL_OK")
</pallas_src>

<mosaic_0001>
module attributes {stable_mosaic.version = 11 : i64} {
  func.func @_mlp_fused_kernel(%arg0: i32, %arg1: memref<64x128xf32, #tpu.memory_space<vmem>>, %arg2: memref<128x128xf32, #tpu.memory_space<vmem>>, %arg3: memref<1x128xf32, #tpu.memory_space<vmem>>, %arg4: memref<128x128xf32, #tpu.memory_space<vmem>>, %arg5: memref<1x128xf32, #tpu.memory_space<vmem>>, %arg6: memref<128x128xf32, #tpu.memory_space<vmem>>, %arg7: memref<1x128xf32, #tpu.memory_space<vmem>>, %arg8: memref<64x128xf32, #tpu.memory_space<vmem>>) attributes {dimension_semantics = [#tpu.dimension_semantics<parallel>], iteration_bounds = array<i64: 1>, scalar_prefetch = 0 : i64, scratch_operands = 0 : i64, tpu.core_type = #tpu.core_type<tc>, window_params = [{transform_indices = @transform_0, window_bounds = array<i64: 64, 128>}, {pipeline_mode = #tpu.pipeline_mode<synchronous>, transform_indices = @transform_1, window_bounds = array<i64: 128, 128>}, {pipeline_mode = #tpu.pipeline_mode<synchronous>, transform_indices = @transform_2, window_bounds = array<i64: 1, 128>}, {pipeline_mode = #tpu.pipeline_mode<synchronous>, transform_indices = @transform_3, window_bounds = array<i64: 128, 128>}, {pipeline_mode = #tpu.pipeline_mode<synchronous>, transform_indices = @transform_4, window_bounds = array<i64: 1, 128>}, {pipeline_mode = #tpu.pipeline_mode<synchronous>, transform_indices = @transform_5, window_bounds = array<i64: 128, 128>}, {pipeline_mode = #tpu.pipeline_mode<synchronous>, transform_indices = @transform_6, window_bounds = array<i64: 1, 128>}, {transform_indices = @transform_7, window_bounds = array<i64: 64, 128>}]} {
    %c0 = arith.constant 0 : index
    %c0_0 = arith.constant 0 : index
    %0 = vector.load %arg1[%c0, %c0_0] : memref<64x128xf32, #tpu.memory_space<vmem>>, vector<64x128xf32>
    %c0_1 = arith.constant 0 : index
    %c0_2 = arith.constant 0 : index
    %1 = vector.load %arg2[%c0_1, %c0_2] : memref<128x128xf32, #tpu.memory_space<vmem>>, vector<128x128xf32>
    %c0_3 = arith.constant 0 : index
    %c0_4 = arith.constant 0 : index
    %2 = vector.load %arg3[%c0_3, %c0_4] : memref<1x128xf32, #tpu.memory_space<vmem>>, vector<1x128xf32>
    %cst = arith.constant dense<0.000000e+00> : vector<64x128xf32>
    %3 = tpu.matmul %0, %1, %cst {dimension_numbers = #tpu.dot_dimension_numbers<[1], [0], [0], [1], [0, 0, 1, 1], [], []>} : vector<64x128xf32>, vector<128x128xf32>, vector<64x128xf32> -> vector<64x128xf32>
    %4 = vector.broadcast %2 : vector<1x128xf32> to vector<64x128xf32>
    %5 = arith.addf %3, %4 : vector<64x128xf32>
    %6 = arith.negf %5 : vector<64x128xf32>
    %7 = math.exp %6 : vector<64x128xf32>
    %cst_5 = arith.constant 1.000000e+00 : f32
    %8 = vector.broadcast %cst_5 : f32 to vector<64x128xf32>
    %9 = arith.addf %8, %7 : vector<64x128xf32>
    %10 = arith.divf %8, %9 : vector<64x128xf32>
    %11 = arith.mulf %5, %10 : vector<64x128xf32>
    %c0_6 = arith.constant 0 : index
    %c0_7 = arith.constant 0 : index
    %12 = vector.load %arg4[%c0_6, %c0_7] : memref<128x128xf32, #tpu.memory_space<vmem>>, vector<128x128xf32>
    %c0_8 = arith.constant 0 : index
    %c0_9 = arith.constant 0 : index
    %13 = vector.load %arg5[%c0_8, %c0_9] : memref<1x128xf32, #tpu.memory_space<vmem>>, vector<1x128xf32>
    %cst_10 = arith.constant dense<0.000000e+00> : vector<64x128xf32>
    %14 = tpu.matmul %11, %12, %cst_10 {dimension_numbers = #tpu.dot_dimension_numbers<[1], [0], [0], [1], [0, 0, 1, 1], [], []>} : vector<64x128xf32>, vector<128x128xf32>, vector<64x128xf32> -> vector<64x128xf32>
    %15 = vector.broadcast %13 : vector<1x128xf32> to vector<64x128xf32>
    %16 = arith.addf %14, %15 : vector<64x128xf32>
    %17 = arith.negf %16 : vector<64x128xf32>
    %18 = math.exp %17 : vector<64x128xf32>
    %cst_11 = arith.constant 1.000000e+00 : f32
    %19 = vector.broadcast %cst_11 : f32 to vector<64x128xf32>
    %20 = arith.addf %19, %18 : vector<64x128xf32>
    %21 = arith.divf %19, %20 : vector<64x128xf32>
    %22 = arith.mulf %16, %21 : vector<64x128xf32>
    %c0_12 = arith.constant 0 : index
    %c0_13 = arith.constant 0 : index
    %23 = vector.load %arg6[%c0_12, %c0_13] : memref<128x128xf32, #tpu.memory_space<vmem>>, vector<128x128xf32>
    %c0_14 = arith.constant 0 : index
    %c0_15 = arith.constant 0 : index
    %24 = vector.load %arg7[%c0_14, %c0_15] : memref<1x128xf32, #tpu.memory_space<vmem>>, vector<1x128xf32>
    %cst_16 = arith.constant dense<0.000000e+00> : vector<64x128xf32>
    %25 = tpu.matmul %22, %23, %cst_16 {dimension_numbers = #tpu.dot_dimension_numbers<[1], [0], [0], [1], [0, 0, 1, 1], [], []>} : vector<64x128xf32>, vector<128x128xf32>, vector<64x128xf32> -> vector<64x128xf32>
    %26 = vector.broadcast %24 : vector<1x128xf32> to vector<64x128xf32>
    %27 = arith.addf %25, %26 : vector<64x128xf32>
    %c0_17 = arith.constant 0 : index
    %c0_18 = arith.constant 0 : index
    %28 = vector.load %arg8[%c0_17, %c0_18] : memref<64x128xf32, #tpu.memory_space<vmem>>, vector<64x128xf32>
    tpu.vector_store %arg8[%c0_17, %c0_18], %27 {strides = array<i32>} : memref<64x128xf32, #tpu.memory_space<vmem>>, vector<64x128xf32>,
    return
  }
  func.func @transform_0(%arg0: i32) -> (i32, i32) {
    %c0_i32 = arith.constant 0 : i32
    %c0_i32_0 = arith.constant 0 : i32
    return %arg0, %c0_i32 : i32, i32
  }
  func.func @transform_1(%arg0: i32) -> (i32, i32) {
    %c0_i32 = arith.constant 0 : i32
    %c0_i32_0 = arith.constant 0 : i32
    %c0_i32_1 = arith.constant 0 : i32
    return %c0_i32, %c0_i32_0 : i32, i32
  }
  func.func @transform_2(%arg0: i32) -> (i32, i32) {
    %c0_i32 = arith.constant 0 : i32
    %c0_i32_0 = arith.constant 0 : i32
    %c0_i32_1 = arith.constant 0 : i32
    return %c0_i32, %c0_i32_0 : i32, i32
  }
  func.func @transform_3(%arg0: i32) -> (i32, i32) {
    %c0_i32 = arith.constant 0 : i32
    %c0_i32_0 = arith.constant 0 : i32
    %c0_i32_1 = arith.constant 0 : i32
    return %c0_i32, %c0_i32_0 : i32, i32
  }
  func.func @transform_4(%arg0: i32) -> (i32, i32) {
    %c0_i32 = arith.constant 0 : i32
    %c0_i32_0 = arith.constant 0 : i32
    %c0_i32_1 = arith.constant 0 : i32
    return %c0_i32, %c0_i32_0 : i32, i32
  }
  func.func @transform_5(%arg0: i32) -> (i32, i32) {
    %c0_i32 = arith.constant 0 : i32
    %c0_i32_0 = arith.constant 0 : i32
    %c0_i32_1 = arith.constant 0 : i32
    return %c0_i32, %c0_i32_0 : i32, i32
  }
  func.func @transform_6(%arg0: i32) -> (i32, i32) {
    %c0_i32 = arith.constant 0 : i32
    %c0_i32_0 = arith.constant 0 : i32
    %c0_i32_1 = arith.constant 0 : i32
    return %c0_i32, %c0_i32_0 : i32, i32
  }
  func.func @transform_7(%arg0: i32) -> (i32, i32) {
    %c0_i32 = arith.constant 0 : i32
    %c0_i32_0 = arith.constant 0 : i32
    return %arg0, %c0_i32 : i32, i32
  }
}

</mosaic_0001>

<bundles_post_ra>
// kernel: tpu_custom_call.1
= control target key start
LH: loop header
LB: loop body
LE: loop exit
PB: predicated region body
PF: predicated region fallthrough
CT: control target
= control target key end

     0   :  { %12 = vsyncpa [#allocation3], 0  ;;  %s1282_s0 = inlined_call_operand.hbm [shape: f32[64,128], index: 0, kind: input, shape index: {}]   ;;  %s1283_s1 = inlined_call_operand.hbm [shape: f32[128,128], index: 1, kind: input, shape index: {}]   ;;  %s1284_s2 = inlined_call_operand.vmem [shape: f32[1,128], index: 2, kind: input, shape index: {}]   ;;  %s1285_s3 = inlined_call_operand.hbm [shape: f32[128,128], index: 3, kind: input, shape index: {}]   ;;  %s1286_s4 = inlined_call_operand.vmem [shape: f32[1,128], index: 4, kind: input, shape index: {}]   ;;  %s1287_s5 = inlined_call_operand.hbm [shape: f32[128,128], index: 5, kind: input, shape index: {}]   ;;  %s1288_s6 = inlined_call_operand.vmem [shape: f32[1,128], index: 6, kind: input, shape index: {}]   ;;  %s1289_s7 = inlined_call_operand.hbm [shape: f32[64,128], index: 7, kind: output, shape index: {}]  }
   0x1   :  { %13 = vsyncpa [#allocation6], 0 }
   0x2   :  { %14 = vsyncpa [#allocation9], 0 }
   0x3   :  { %15 = vsyncpa [#allocation4], 0  ;;  %s1137_s24 = smov [#allocation5]   ;;  %s1138_s26 = smov [#allocation2]  }
   0x4   :  { %s33_s25 = sshll.u32 %s1137_s24, 4  ;;  %s21_s27 = sshll.u32 %s1138_s26, 4  ;;  %s34_s25 = int_to_ptr.vmem [resolvable:$true] %s33_s25  ;;  %s1184_s27 = int_to_ptr.vmem [resolvable:$true] %s21_s27 }
   0x5   :  { %s1019_s30 = scalar_lea.hbm %s1283_s1, 2048 }
   0x6   :  { %p1020_p0 = scmp.ne.s32.totalorder %s1283_s1, %s1019_s30  ;;  %p1023_p1 = scmp.lt.u32.totalorder %s1019_s30, %s1283_s1 }
   0x8   :  { %p1025_p2 = pnand %p1023_p1, %p1020_p0 }
   0xa   :  { %1028 = shalt.err (!%p1025_p2)
}
   0xb   :  { %s1029_s12 = scalar_lea.vmem %s34_s25, 2048  ;;  %p1034_p4 = scmp.lt.s32.totalorder %s34_s25, %s34_s25 }
   0xc   :  { %p1030_p3 = scmp.ne.s32.totalorder %s34_s25, %s1029_s12  ;;  %p1035_p5 = scmp.lt.s32.totalorder %s1029_s12, %s1029_s12 }
   0xe   :  { %p1036_p6 = por %p1035_p5, %p1034_p4 }
  0x10   :  { %p1037_p7 = pnand %p1036_p6, %p1030_p3 }
  0x12   :  { %1040 = shalt.err (!%p1037_p7)
}
  0x13   :  { %s1139_s13 = smov 128   ;;  %s1140_s14 = smov 8  }
  0x14   :  { %39 = dma.hbm_to_vmem [thread:$0]  %s1283_s1, 2048, %s34_s25, [#allocation6], %s1139_s13, %s1139_s13, %s1140_s14  }
  0x15   :  { %s1041_s19 = scalar_lea.hbm %s1282_s0, 1024 }
  0x16   :  { %p1042_p8 = scmp.ne.s32.totalorder %s1282_s0, %s1041_s19  ;;  %p1045_p9 = scmp.lt.u32.totalorder %s1041_s19, %s1282_s0 }
  0x18   :  { %p1047_p10 = pnand %p1045_p9, %p1042_p8 }
  0x1a   :  { %1050 = shalt.err (!%p1047_p10)
}
  0x1b   :  { %s1051_s24 = scalar_lea.vmem %s1184_s27, 1024  ;;  %p1056_p12 = scmp.lt.s32.totalorder %s1184_s27, %s1184_s27 }
  0x1c   :  { %p1052_p11 = scmp.ne.s32.totalorder %s1184_s27, %s1051_s24  ;;  %p1057_p13 = scmp.lt.s32.totalorder %s1051_s24, %s1051_s24 }
  0x1e   :  { %p1058_p0 = por %p1057_p13, %p1056_p12 }
  0x20   :  { %p1059_p1 = pnand %p1058_p0, %p1052_p11 }
  0x22   :  { %1062 = shalt.err (!%p1059_p1)
}
  0x23   :  { %27 = dma.hbm_to_vmem [thread:$0]  %s1282_s0, 1024, %s1184_s27, [#allocation3], %s1139_s13, %s1139_s13, %s1140_s14  }
  0x24   :  { %s1141_s26 = smov [#allocation7]   ;;  %s1142_s29 = smov [#allocation8]  }
  0x25   :  { %s47_s28 = sshll.u32 %s1141_s26, 4  ;;  %s61_s30 = sshll.u32 %s1142_s29, 4  ;;  %s48_s28 = int_to_ptr.vmem [resolvable:$true] %s47_s28  ;;  %s1221_s30 = int_to_ptr.vmem [resolvable:$true] %s61_s30 }
  0x26   :  { %s1063_s10 = scalar_lea.hbm %s1285_s3, 2048 }
  0x27   :  { %p1064_p2 = scmp.ne.s32.totalorder %s1285_s3, %s1063_s10  ;;  %p1067_p3 = scmp.lt.u32.totalorder %s1063_s10, %s1285_s3 }
  0x29   :  { %p1069_p4 = pnand %p1067_p3, %p1064_p2 }
  0x2b   :  { %1072 = shalt.err (!%p1069_p4)
}
  0x2c   :  { %s1073_s0 = scalar_lea.vmem %s48_s28, 2048  ;;  %p1078_p6 = scmp.lt.s32.totalorder %s48_s28, %s48_s28 }
  0x2d   :  { %p1074_p5 = scmp.ne.s32.totalorder %s48_s28, %s1073_s0  ;;  %p1079_p7 = scmp.lt.s32.totalorder %s1073_s0, %s1073_s0 }
  0x2f   :  { %p1080_p8 = por %p1079_p7, %p1078_p6 }
  0x31   :  { %p1081_p9 = pnand %p1080_p8, %p1074_p5 }
  0x33   :  { %1084 = shalt.err (!%p1081_p9)
}
  0x34   :  { %53 = dma.hbm_to_vmem [thread:$0]  %s1285_s3, 2048, %s48_s28, [#allocation6], %s1139_s13, %s1139_s13, %s1140_s14  }
  0x35   :  { %s1085_s20 = scalar_lea.hbm %s1287_s5, 2048 }
  0x36   :  { %p1086_p10 = scmp.ne.s32.totalorder %s1287_s5, %s1085_s20  ;;  %p1089_p11 = scmp.lt.u32.totalorder %s1085_s20, %s1287_s5 }
  0x38   :  { %p1091_p12 = pnand %p1089_p11, %p1086_p10 }
  0x3a   :  { %1094 = shalt.err (!%p1091_p12)
}
  0x3b   :  { %s1095_s1 = scalar_lea.vmem %s1221_s30, 2048  ;;  %p1100_p0 = scmp.lt.s32.totalorder %s1221_s30, %s1221_s30 }
  0x3c   :  { %p1096_p13 = scmp.ne.s32.totalorder %s1221_s30, %s1095_s1  ;;  %p1101_p1 = scmp.lt.s32.totalorder %s1095_s1, %s1095_s1 }
  0x3e   :  { %p1102_p2 = por %p1101_p1, %p1100_p0 }
  0x40   :  { %p1103_p3 = pnand %p1102_p2, %p1096_p13 }
  0x42   :  { %1106 = shalt.err (!%p1103_p3)
}
  0x43   :  { %67 = dma.hbm_to_vmem [thread:$0]  %s1287_s5, 2048, %s1221_s30, [#allocation9], %s1139_s13, %s1139_s13, %s1140_s14  }
  0x44   :  { %1129 = dma.done.wait [#allocation3], 1024  }
  0x45   :  { %1130 = vsyncadd [#allocation3], 4294966272 }
  0x46   :  { %1131 = dma.done.wait [#allocation6], 4096  }
  0x47   :  { %1132 = vsyncadd [#allocation6], 4294963200 }
  0x48   :  { %1133 = dma.done.wait [#allocation9], 2048  }
  0x49   :  { %1134 = vsyncadd [#allocation9], 4294965248  ;;  %v90_v0 = vld [vmem:[#allocation5] sm:$0xff]  ;;  %v91_v1 = vld [vmem:[#allocation5 + $0x8] sm:$0xff]  ;;  %s1143_s30 = smov [#allocation10]  }
  0x4a   :  { %v92_v2 = vld [vmem:[#allocation5 + $0x10] sm:$0xff]  ;;  %v836_v3 = vpack.c.bf16 %v91_v1, %v90_v0  ;;  %v93_v4 = vld [vmem:[#allocation5 + $0x18] sm:$0xff]  ;;  %v94_v6 = vld [vmem:[#allocation5 + $0x20] sm:$0xff] }
  0x4b   :  { %v840_v5 = vpack.c.bf16 %v93_v4, %v92_v2  ;;  %v95_v7 = vld [vmem:[#allocation5 + $0x28] sm:$0xff]  ;;  %v82_v9 = vld [vmem:[#allocation2] sm:$0xff]  ;;  %v96_v10 = vld [vmem:[#allocation5 + $0x30] sm:$0xff] }
  0x4c   :  { %837 = vmatprep.subr.bf16.mxu0 %v836_v3  ;;  %v844_v8 = vpack.c.bf16 %v95_v7, %v94_v6  ;;  %v97_v11 = vld [vmem:[#allocation5 + $0x38] sm:$0xff]  ;;  %736 = vmatprep.mubr.f32.mxu0 %v82_v9  ;;  %v98_v13 = vld [vmem:[#allocation5 + $0x40] sm:$0xff]  ;;  %v99_v14 = vld [vmem:[#allocation5 + $0x48] sm:$0xff] }
  0x4d   :  { %839 = vmatpush3.bf16.msra.mxu0 %v836_v3  ;;  %v848_v12 = vpack.c.bf16 %v97_v11, %v96_v10  ;;  %v852_v15 = vpack.c.bf16 %v99_v14, %v98_v13  ;;  %v100_v16 = vld [vmem:[#allocation5 + $0x50] sm:$0xff]  ;;  %v101_v17 = vld [vmem:[#allocation5 + $0x58] sm:$0xff]  ;;  %v102_v19 = vld [vmem:[#allocation5 + $0x60] sm:$0xff] }
  0x4e   :  { %841 = vmatprep.subr.bf16.mxu0 %v840_v5  ;;  %v856_v18 = vpack.c.bf16 %v101_v17, %v100_v16  ;;  %v103_v20 = vld [vmem:[#allocation5 + $0x68] sm:$0xff]  ;;  %v104_v22 = vld [vmem:[#allocation5 + $0x70] sm:$0xff]  ;;  %v105_v23 = vld [vmem:[#allocation5 + $0x78] sm:$0xff] }
  0x4f   :  { %v860_v21 = vpack.c.bf16 %v103_v20, %v102_v19  ;;  %v864_v24 = vpack.c.bf16 %v105_v23, %v104_v22  ;;  %v83_v25 = vld [vmem:[#allocation2 + $0x8] sm:$0xff]  ;;  %v84_v26 = vld [vmem:[#allocation2 + $0x10] sm:$0xff]  ;;  %v85_v27 = vld [vmem:[#allocation2 + $0x18] sm:$0xff] }
  0x50   :  { %v86_v28 = vld [vmem:[#allocation2 + $0x20] sm:$0xff]  ;;  %v87_v29 = vld [vmem:[#allocation2 + $0x28] sm:$0xff]  ;;  %v88_v30 = vld [vmem:[#allocation2 + $0x30] sm:$0xff] }
  0x51   :  { %843 = vmatpush3.bf16.msra.mxu0 %v840_v5  ;;  %v89_v31 = vld [vmem:[#allocation2 + $0x38] sm:$0xff]  ;;  %v274_v32 = vld [vmem:[#allocation7] sm:$0xff]  ;;  %v275_v33 = vld [vmem:[#allocation7 + $0x8] sm:$0xff] }
  0x52   :  { %845 = vmatprep.subr.bf16.mxu0 %v844_v8  ;;  %v868_v34 = vpack.c.bf16 %v275_v33, %v274_v32  ;;  %v276_v35 = vld [vmem:[#allocation7 + $0x10] sm:$0xff]  ;;  %v277_v36 = vld [vmem:[#allocation7 + $0x18] sm:$0xff]  ;;  %v278_v38 = vld [vmem:[#allocation7 + $0x20] sm:$0xff] }
  0x53   :  { %v872_v37 = vpack.c.bf16 %v277_v36, %v276_v35  ;;  %v279_v39 = vld [vmem:[#allocation7 + $0x28] sm:$0xff]  ;;  %v280_v41 = vld [vmem:[#allocation7 + $0x30] sm:$0xff]  ;;  %v281_v42 = vld [vmem:[#allocation7 + $0x38] sm:$0xff] }
  0x54   :  { %869 = vmatprep.subr.bf16.mxu1 %v868_v34  ;;  %v876_v40 = vpack.c.bf16 %v279_v39, %v278_v38  ;;  %v880_v43 = vpack.c.bf16 %v281_v42, %v280_v41  ;;  %v282_v44 = vld [vmem:[#allocation7 + $0x40] sm:$0xff]  ;;  %v283_v45 = vld [vmem:[#allocation7 + $0x48] sm:$0xff]  ;;  %v284_v47 = vld [vmem:[#allocation7 + $0x50] sm:$0xff] }
  0x55   :  { %847 = vmatpush3.bf16.msra.mxu0 %v844_v8  ;;  %871 = vmatpush3.bf16.msra.mxu1 %v868_v34  ;;  %v884_v46 = vpack.c.bf16 %v283_v45, %v282_v44  ;;  %v285_v48 = vld [vmem:[#allocation7 + $0x58] sm:$0xff]  ;;  %v286_v50 = vld [vmem:[#allocation7 + $0x60] sm:$0xff]  ;;  %v287_v51 = vld [vmem:[#allocation7 + $0x68] sm:$0xff] }
  0x56   :  { %849 = vmatprep.subr.bf16.mxu0 %v848_v12  ;;  %873 = vmatprep.subr.bf16.mxu1 %v872_v37  ;;  %v888_v49 = vpack.c.bf16 %v285_v48, %v284_v47  ;;  %v892_v52 = vpack.c.bf16 %v287_v51, %v286_v50  ;;  %v288_v53 = vld [vmem:[#allocation7 + $0x70] sm:$0xff]  ;;  %v289_v54 = vld [vmem:[#allocation7 + $0x78] sm:$0xff]  ;;  %v613_v56 = vld [vmem:[%s1284_s2] ss:$0 sm:$0xff] }
  0x57   :  { %v896_v55 = vpack.c.bf16 %v289_v54, %v288_v53  ;;  %v459_v50 = vld [vmem:[#allocation8 + $0x8] sm:$0xff]  ;;  %v461_v53 = vld [vmem:[#allocation8 + $0x18] sm:$0xff] }
  0x59   :  { %851 = vmatpush3.bf16.msra.mxu0 %v848_v12  ;;  %875 = vmatpush3.bf16.msra.mxu1 %v872_v37 }
  0x5a   :  { %853 = vmatprep.subr.bf16.mxu0 %v852_v15  ;;  %877 = vmatprep.subr.bf16.mxu1 %v876_v40 }
  0x5d   :  { %855 = vmatpush3.bf16.msra.mxu0 %v852_v15  ;;  %879 = vmatpush3.bf16.msra.mxu1 %v876_v40 }
  0x5e   :  { %857 = vmatprep.subr.bf16.mxu0 %v856_v18  ;;  %881 = vmatprep.subr.bf16.mxu1 %v880_v43 }
  0x61   :  { %859 = vmatpush3.bf16.msra.mxu0 %v856_v18  ;;  %883 = vmatpush3.bf16.msra.mxu1 %v880_v43 }
  0x62   :  { %861 = vmatprep.subr.bf16.mxu0 %v860_v21  ;;  %885 = vmatprep.subr.bf16.mxu1 %v884_v46 }
  0x65   :  { %863 = vmatpush3.bf16.msra.mxu0 %v860_v21  ;;  %887 = vmatpush3.bf16.msra.mxu1 %v884_v46 }
  0x66   :  { %865 = vmatprep.subr.bf16.mxu0 %v864_v24  ;;  %889 = vmatprep.subr.bf16.mxu1 %v888_v49 }
  0x69   :  { %867 = vmatpush3.bf16.msra.mxu0 %v864_v24  ;;  %891 = vmatpush3.bf16.msra.mxu1 %v888_v49  ;;  %v458_v49 = vld [vmem:[#allocation8] sm:$0xff] }
  0x6a   :  { %893 = vmatprep.subr.bf16.mxu1 %v892_v52  ;;  %v900_v51 = vpack.c.bf16 %v459_v50, %v458_v49 }
  0x6c   :  { %737 = vmatmul.mubr.f32.vlgmr.msra.gmra.mrb[0].mxu0 %v83_v25  ;;  %901 = vmatprep.subr.bf16.mxu0 %v900_v51 }
  0x6d   :  { %739 = vmatprep.mubr.f32.mxu0 %v84_v26  ;;  %895 = vmatpush3.bf16.msra.mxu1 %v892_v52  ;;  %v460_v52 = vld [vmem:[#allocation8 + $0x10] sm:$0xff] }
  0x6e   :  { %897 = vmatprep.subr.bf16.mxu1 %v896_v55  ;;  %903 = vmatpush3.bf16.msra.mxu0 %v900_v51  ;;  %v904_v54 = vpack.c.bf16 %v461_v53, %v460_v52 }
  0x70   :  { %740 = vmatmul.mubr.f32.gmra.mrb[2].mxu0 %v85_v27  ;;  %905 = vmatprep.subr.bf16.mxu0 %v904_v54 }
  0x71   :  { %742 = vmatprep.mubr.f32.mxu0 %v86_v28  ;;  %899 = vmatpush3.bf16.msra.mxu1 %v896_v55  ;;  %v462_v55 = vld [vmem:[#allocation8 + $0x20] sm:$0xff] }
  0x72   :  { %932 = vmatprep.subr.bf16.mxu1 %v900_v51  ;;  %907 = vmatpush3.bf16.msra.mxu0 %v904_v54 }
  0x74   :  { %743 = vmatmul.mubr.f32.gmra.mrb[4].mxu0 %v87_v29 }
  0x75   :  { %745 = vmatprep.mubr.f32.mxu0 %v88_v30 }
  0x78   :  { %746 = vmatmul.mubr.f32.gmra.mrb[6].mxu0 %v89_v31 }
 0x13f   :  { %v738_v57 = vpop.f32.mrb[0].mxu0 }
 0x140   :  { %v185_v58 = vadd.f32 %v738_v57, %v613_v56  ;;  %v179_v59 = vpop.f32.mrb[1].mxu0 }
 0x141   :  { %v180_v60 = vadd.f32 %v613_v56, %v179_v59  ;;  %v465_v59 = vld [vmem:[#allocation8 + $0x38] sm:$0xff] }
 0x142   :  { %v615_v61 = vmul.f32 -1.442695, %v185_v58 }
 0x143   :  { %v614_v62 = vmul.f32 -1.442695, %v180_v60  ;;  %v741_v63 = vpop.f32.mrb[2].mxu0 }
 0x144   :  { %955 = vpow2.f32 %v615_v61  ;;  %v195_v0 = vadd.f32 %v741_v63, %v613_v56  ;;  %v189_v1 = vpop.f32.mrb[3].mxu0  ;;  %v466_v61 = vld [vmem:[#allocation8 + $0x40] sm:$0xff] }
 0x145   :  { %957 = vpow2.f32 %v614_v62  ;;  %v190_v2 = vadd.f32 %v613_v56, %v189_v1  ;;  %v467_v62 = vld [vmem:[#allocation8 + $0x48] sm:$0xff]  ;;  %v469_v1 = vld [vmem:[#allocation8 + $0x58] sm:$0xff] }
 0x146   :  { %v617_v3 = vmul.f32 -1.442695, %v195_v0  ;;  %v916_v63 = vpack.c.bf16 %v467_v62, %v466_v61 }
 0x147   :  { %v616_v4 = vmul.f32 -1.442695, %v190_v2  ;;  %v744_v5 = vpop.f32.mrb[4].mxu0 }
 0x148   :  { %959 = vpow2.f32 %v617_v3  ;;  %v205_v6 = vadd.f32 %v744_v5, %v613_v56  ;;  %v199_v7 = vpop.f32.mrb[5].mxu0  ;;  %v470_v3 = vld [vmem:[#allocation8 + $0x60] sm:$0xff] }
 0x149   :  { %961 = vpow2.f32 %v616_v4  ;;  %v200_v8 = vadd.f32 %v613_v56, %v199_v7  ;;  %v471_v4 = vld [vmem:[#allocation8 + $0x68] sm:$0xff]  ;;  %v473_v7 = vld [vmem:[#allocation8 + $0x78] sm:$0xff] }
 0x14a   :  { %v619_v9 = vmul.f32 -1.442695, %v205_v6  ;;  %v924_v5 = vpack.c.bf16 %v471_v4, %v470_v3 }
 0x14b   :  { %v618_v10 = vmul.f32 -1.442695, %v200_v8  ;;  %v747_v11 = vpop.f32.mrb[6].mxu0 }
 0x14c   :  { %963 = vpow2.f32 %v619_v9  ;;  %v215_v12 = vadd.f32 %v747_v11, %v613_v56  ;;  %v209_v13 = vpop.f32.mrb[7].mxu0  ;;  %v622_v9 = vld [vmem:[%s1286_s4] ss:$0 sm:$0xff] }
 0x14d   :  { %965 = vpow2.f32 %v618_v10  ;;  %v210_v14 = vadd.f32 %v613_v56, %v209_v13  ;;  %v463_v56 = vld [vmem:[#allocation8 + $0x28] sm:$0xff] }
 0x14e   :  { %v956_v15 = vpop.eup %955  ;;  %v621_v16 = vmul.f32 -1.442695, %v215_v12  ;;  %v908_v57 = vpack.c.bf16 %v463_v56, %v462_v55 }
 0x14f   :  { %v958_v17 = vpop.eup %957  ;;  %v243_v18 = vadd.f32 1.0, %v956_v15  ;;  %v620_v19 = vmul.f32 -1.442695, %v210_v14 }
 0x150   :  { %v242_v20 = vadd.f32 1.0, %v958_v17  ;;  %967 = vpow2.f32 %v621_v16  ;;  %909 = vmatprep.subr.bf16.mxu0 %v908_v57 }
 0x151   :  { %969 = vrcp.f32 %v243_v18  ;;  %911 = vmatpush3.bf16.msra.mxu0 %v908_v57 }
 0x152   :  { %v960_v21 = vpop.eup %959  ;;  %971 = vrcp.f32 %v242_v20 }
 0x153   :  { %v962_v22 = vpop.eup %961  ;;  %v245_v23 = vadd.f32 1.0, %v960_v21  ;;  %973 = vpow2.f32 %v620_v19 }
 0x154   :  { %v244_v24 = vadd.f32 1.0, %v962_v22 }
 0x155   :  { %975 = vrcp.f32 %v245_v23 }
 0x156   :  { %v964_v25 = vpop.eup %963  ;;  %977 = vrcp.f32 %v244_v24 }
 0x157   :  { %v966_v26 = vpop.eup %965  ;;  %v247_v27 = vadd.f32 1.0, %v964_v25 }
 0x158   :  { %v246_v28 = vadd.f32 1.0, %v966_v26 }
 0x159   :  { %979 = vrcp.f32 %v247_v27 }
 0x15a   :  { %v968_v29 = vpop.eup %967  ;;  %981 = vrcp.f32 %v246_v28 }
 0x15b   :  { %v970_v30 = vpop.eup %969  ;;  %v249_v31 = vadd.f32 1.0, %v968_v29 }
 0x15c   :  { %v972_v32 = vpop.eup %971  ;;  %v267_v35 = vmul.f32 %v970_v30, %v185_v58  ;;  %v464_v58 = vld [vmem:[#allocation8 + $0x30] sm:$0xff] }
 0x15d   :  { %v974_v33 = vpop.eup %973  ;;  %v266_v34 = vmul.f32 %v972_v32, %v180_v60  ;;  %983 = vrcp.f32 %v249_v31  ;;  %v912_v60 = vpack.c.bf16 %v465_v59, %v464_v58 }
 0x15e   :  { %v248_v36 = vadd.f32 1.0, %v974_v33 }
 0x15f   :  { %v976_v37 = vpop.eup %975  ;;  %780 = vmatprep.mubr.f32.mxu1 %v266_v34  ;;  %913 = vmatprep.subr.bf16.mxu0 %v912_v60 }
 0x160   :  { %v978_v38 = vpop.eup %977  ;;  %985 = vrcp.f32 %v248_v36  ;;  %781 = vmatmul.mubr.f32.vlgmr.msra.gmra.mrb[0].mxu1 %v267_v35  ;;  %v269_v40 = vmul.f32 %v976_v37, %v195_v0  ;;  %915 = vmatpush3.bf16.msra.mxu0 %v912_v60  ;;  %v468_v0 = vld [vmem:[#allocation8 + $0x50] sm:$0xff] }
 0x161   :  { %v268_v39 = vmul.f32 %v978_v38, %v190_v2  ;;  %940 = vmatpush3.bf16.msra.mxu1 %v900_v51  ;;  %917 = vmatprep.subr.bf16.mxu0 %v916_v63  ;;  %v920_v2 = vpack.c.bf16 %v469_v1, %v468_v0 }
 0x162   :  { %933 = vmatprep.subr.bf16.mxu1 %v904_v54 }
 0x163   :  { %v980_v41 = vpop.eup %979  ;;  %783 = vmatprep.mubr.f32.mxu1 %v268_v39 }
 0x164   :  { %v982_v42 = vpop.eup %981  ;;  %784 = vmatmul.mubr.f32.gmra.mrb[2].mxu1 %v269_v40  ;;  %v271_v44 = vmul.f32 %v980_v41, %v205_v6  ;;  %919 = vmatpush3.bf16.msra.mxu0 %v916_v63  ;;  %v472_v6 = vld [vmem:[#allocation8 + $0x70] sm:$0xff] }
 0x165   :  { %v270_v43 = vmul.f32 %v982_v42, %v200_v8  ;;  %941 = vmatpush3.bf16.msra.mxu1 %v904_v54  ;;  %921 = vmatprep.subr.bf16.mxu0 %v920_v2  ;;  %v928_v8 = vpack.c.bf16 %v473_v7, %v472_v6 }
 0x166   :  { %934 = vmatprep.subr.bf16.mxu1 %v908_v57 }
 0x167   :  { %786 = vmatprep.mubr.f32.mxu1 %v270_v43  ;;  %v984_v45 = vpop.eup %983 }
 0x168   :  { %787 = vmatmul.mubr.f32.gmra.mrb[4].mxu1 %v271_v44  ;;  %v273_v48 = vmul.f32 %v984_v45, %v215_v12  ;;  %923 = vmatpush3.bf16.msra.mxu0 %v920_v2 }
 0x169   :  { %942 = vmatpush3.bf16.msra.mxu1 %v908_v57  ;;  %925 = vmatprep.subr.bf16.mxu0 %v924_v5 }
 0x16a   :  { %v986_v46 = vpop.eup %985  ;;  %935 = vmatprep.subr.bf16.mxu1 %v912_v60 }
 0x16b   :  { %v272_v47 = vmul.f32 %v986_v46, %v210_v14 }
 0x16c   :  { %927 = vmatpush3.bf16.msra.mxu0 %v924_v5 }
 0x16d   :  { %789 = vmatprep.mubr.f32.mxu1 %v272_v47  ;;  %943 = vmatpush3.bf16.msra.mxu1 %v912_v60 }
 0x16e   :  { %790 = vmatmul.mubr.f32.gmra.mrb[6].mxu1 %v273_v48  ;;  %936 = vmatprep.subr.bf16.mxu1 %v916_v63 }
 0x16f   :  { %929 = vmatprep.subr.bf16.mxu0 %v928_v8 }
 0x170   :  { %931 = vmatpush3.bf16.msra.mxu0 %v928_v8 }
 0x171   :  { %944 = vmatpush3.bf16.msra.mxu1 %v916_v63 }
 0x172   :  { %937 = vmatprep.subr.bf16.mxu1 %v920_v2 }
 0x175   :  { %945 = vmatpush3.bf16.msra.mxu1 %v920_v2  ;;  %v631_v2 = vld [vmem:[%s1288_s6] ss:$0 sm:$0xff]  ;;  %s599_s6 = sshll.u32 %s1143_s30, 4  ;;  %s600_s6 = int_to_ptr.vmem [resolvable:$true] %s599_s6 }
 0x176   :  { %938 = vmatprep.subr.bf16.mxu1 %v924_v5  ;;  %s1107_s8 = scalar_lea.vmem %s600_s6, 1024  ;;  %p1112_p5 = scmp.lt.s32.totalorder %s600_s6, %s600_s6 }
 0x177   :  { %p1108_p4 = scmp.ne.s32.totalorder %s600_s6, %s1107_s8  ;;  %p1113_p6 = scmp.lt.s32.totalorder %s1107_s8, %s1107_s8 }
 0x179   :  { %946 = vmatpush3.bf16.msra.mxu1 %v924_v5  ;;  %p1114_p7 = por %p1113_p6, %p1112_p5 }
 0x17a   :  { %939 = vmatprep.subr.bf16.mxu1 %v928_v8 }
 0x17b   :  { %p1115_p8 = pnand %p1114_p7, %p1108_p4 }
 0x17d   :  { %947 = vmatpush3.bf16.msra.mxu1 %v928_v8 }
 0x233   :  { %v782_v10 = vpop.f32.mrb[0].mxu1 }
 0x234   :  { %v369_v11 = vadd.f32 %v782_v10, %v622_v9  ;;  %v363_v12 = vpop.f32.mrb[1].mxu1 }
 0x235   :  { %v364_v13 = vadd.f32 %v622_v9, %v363_v12 }
 0x236   :  { %v624_v14 = vmul.f32 -1.442695, %v369_v11 }
 0x237   :  { %v623_v15 = vmul.f32 -1.442695, %v364_v13  ;;  %v785_v16 = vpop.f32.mrb[2].mxu1 }
 0x238   :  { %987 = vpow2.f32 %v624_v14  ;;  %v379_v17 = vadd.f32 %v785_v16, %v622_v9  ;;  %v373_v18 = vpop.f32.mrb[3].mxu1 }
 0x239   :  { %989 = vpow2.f32 %v623_v15  ;;  %v374_v19 = vadd.f32 %v622_v9, %v373_v18 }
 0x23a   :  { %v626_v20 = vmul.f32 -1.442695, %v379_v17 }
 0x23b   :  { %v625_v21 = vmul.f32 -1.442695, %v374_v19  ;;  %v788_v22 = vpop.f32.mrb[4].mxu1 }
 0x23c   :  { %991 = vpow2.f32 %v626_v20  ;;  %v389_v23 = vadd.f32 %v788_v22, %v622_v9  ;;  %v383_v24 = vpop.f32.mrb[5].mxu1 }
 0x23d   :  { %993 = vpow2.f32 %v625_v21  ;;  %v384_v25 = vadd.f32 %v622_v9, %v383_v24 }
 0x23e   :  { %v628_v26 = vmul.f32 -1.442695, %v389_v23 }
 0x23f   :  { %v627_v27 = vmul.f32 -1.442695, %v384_v25 }
 0x240   :  { %995 = vpow2.f32 %v628_v26 }
 0x241   :  { %997 = vpow2.f32 %v627_v27  ;;  %v791_v28 = vpop.f32.mrb[6].mxu1 }
 0x242   :  { %v988_v29 = vpop.eup %987  ;;  %v399_v30 = vadd.f32 %v791_v28, %v622_v9  ;;  %v393_v31 = vpop.f32.mrb[7].mxu1 }
 0x243   :  { %v990_v32 = vpop.eup %989  ;;  %v427_v33 = vadd.f32 1.0, %v988_v29  ;;  %v394_v34 = vadd.f32 %v622_v9, %v393_v31 }
 0x244   :  { %v426_v35 = vadd.f32 1.0, %v990_v32  ;;  %v630_v36 = vmul.f32 -1.442695, %v399_v30 }
 0x245   :  { %999 = vrcp.f32 %v427_v33  ;;  %v629_v37 = vmul.f32 -1.442695, %v394_v34 }
 0x246   :  { %v992_v38 = vpop.eup %991  ;;  %1001 = vrcp.f32 %v426_v35 }
 0x247   :  { %v994_v39 = vpop.eup %993  ;;  %v429_v40 = vadd.f32 1.0, %v992_v38  ;;  %1003 = vpow2.f32 %v630_v36 }
 0x248   :  { %v428_v41 = vadd.f32 1.0, %v994_v39  ;;  %1005 = vpow2.f32 %v629_v37 }
 0x249   :  { %1007 = vrcp.f32 %v429_v40 }
 0x24a   :  { %v996_v42 = vpop.eup %995  ;;  %1009 = vrcp.f32 %v428_v41 }
 0x24b   :  { %v998_v43 = vpop.eup %997  ;;  %v431_v44 = vadd.f32 1.0, %v996_v42 }
 0x24c   :  { %v430_v45 = vadd.f32 1.0, %v998_v43 }
 0x24d   :  { %1011 = vrcp.f32 %v431_v44 }
 0x24e   :  { %1013 = vrcp.f32 %v430_v45 }
 0x24f   :  { %v1000_v46 = vpop.eup %999 }
 0x250   :  { %v1002_v47 = vpop.eup %1001  ;;  %v451_v51 = vmul.f32 %v1000_v46, %v369_v11 }
 0x251   :  { %v1004_v48 = vpop.eup %1003  ;;  %v450_v49 = vmul.f32 %v1002_v47, %v364_v13 }
 0x252   :  { %v1006_v50 = vpop.eup %1005  ;;  %v433_v52 = vadd.f32 1.0, %v1004_v48 }
 0x253   :  { %v1008_v53 = vpop.eup %1007  ;;  %v432_v54 = vadd.f32 1.0, %v1006_v50  ;;  %824 = vmatprep.mubr.f32.mxu0 %v450_v49 }
 0x254   :  { %v1010_v55 = vpop.eup %1009  ;;  %1015 = vrcp.f32 %v433_v52  ;;  %825 = vmatmul.mubr.f32.vlgmr.msra.gmra.mrb[8].mxu0 %v451_v51  ;;  %v453_v57 = vmul.f32 %v1008_v53, %v379_v17 }
 0x255   :  { %v452_v56 = vmul.f32 %v1010_v55, %v374_v19  ;;  %1017 = vrcp.f32 %v432_v54 }
 0x257   :  { %v1012_v58 = vpop.eup %1011  ;;  %827 = vmatprep.mubr.f32.mxu0 %v452_v56 }
 0x258   :  { %v1014_v59 = vpop.eup %1013  ;;  %828 = vmatmul.mubr.f32.gmra.mrb[10].mxu0 %v453_v57  ;;  %v455_v61 = vmul.f32 %v1012_v58, %v389_v23 }
 0x259   :  { %v454_v60 = vmul.f32 %v1014_v59, %v384_v25 }
 0x25b   :  { %830 = vmatprep.mubr.f32.mxu1 %v454_v60 }
 0x25c   :  { %831 = vmatmul.mubr.f32.vlgmr.msra.gmra.mrb[8].mxu1 %v455_v61 }
 0x25e   :  { %v1016_v62 = vpop.eup %1015 }
 0x25f   :  { %v1018_v63 = vpop.eup %1017  ;;  %v457_v1 = vmul.f32 %v1016_v62, %v399_v30 }
 0x260   :  { %v456_v0 = vmul.f32 %v1018_v63, %v394_v34 }
 0x262   :  { %833 = vmatprep.mubr.f32.mxu1 %v456_v0 }
 0x263   :  { %834 = vmatmul.mubr.f32.gmra.mrb[10].mxu1 %v457_v1 }
 0x327   :  { %v826_v3 = vpop.f32.mrb[8].mxu0 }
 0x328   :  { %v553_v4 = vadd.f32 %v826_v3, %v631_v2  ;;  %v547_v5 = vpop.f32.mrb[9].mxu0 }
 0x329   :  { %v548_v6 = vadd.f32 %v631_v2, %v547_v5 }
 0x32a   :  { %587 = vst [vmem:[#allocation10 + $0x8] sm:$0xff] %v553_v4 }
 0x32b   :  { %586 = vst [vmem:[#allocation10] sm:$0xff] %v548_v6  ;;  %v829_v7 = vpop.f32.mrb[10].mxu0 }
 0x32c   :  { %v563_v8 = vadd.f32 %v829_v7, %v631_v2  ;;  %v557_v9 = vpop.f32.mrb[11].mxu0 }
 0x32d   :  { %v558_v10 = vadd.f32 %v631_v2, %v557_v9 }
 0x32e   :  { %589 = vst [vmem:[#allocation10 + $0x18] sm:$0xff] %v563_v8 }
 0x32f   :  { %588 = vst [vmem:[#allocation10 + $0x10] sm:$0xff] %v558_v10  ;;  %v832_v11 = vpop.f32.mrb[8].mxu1 }
 0x330   :  { %v573_v12 = vadd.f32 %v832_v11, %v631_v2  ;;  %v567_v13 = vpop.f32.mrb[9].mxu1 }
 0x331   :  { %v568_v14 = vadd.f32 %v631_v2, %v567_v13 }
 0x332   :  { %591 = vst [vmem:[#allocation10 + $0x28] sm:$0xff] %v573_v12 }
 0x333   :  { %590 = vst [vmem:[#allocation10 + $0x20] sm:$0xff] %v568_v14 }
 0x336   :  { %v835_v15 = vpop.f32.mrb[10].mxu1 }
 0x337   :  { %v583_v16 = vadd.f32 %v835_v15, %v631_v2  ;;  %v577_v17 = vpop.f32.mrb[11].mxu1 }
 0x338   :  { %v578_v18 = vadd.f32 %v631_v2, %v577_v17 }
 0x339   :  { %593 = vst [vmem:[#allocation10 + $0x38] sm:$0xff] %v583_v16 }
 0x33a   :  { %592 = vst [vmem:[#allocation10 + $0x30] sm:$0xff] %v578_v18 }
 0x33b   :  { %1118 = shalt.err (!%p1115_p8)
}
 0x33c   :  { %s1119_s11 = scalar_lea.hbm %s1289_s7, 1024 }
 0x33d   :  { %p1120_p9 = scmp.ne.s32.totalorder %s1289_s7, %s1119_s11  ;;  %p1123_p10 = scmp.lt.u32.totalorder %s1119_s11, %s1289_s7 }
 0x33f   :  { %p1125_p11 = pnand %p1123_p10, %p1120_p9 }
 0x341   :  { %1128 = shalt.err (!%p1125_p11)
}
 0x342   :  { %605 = dma.vmem_to_hbm [thread:$0]  %s600_s6, 1024, %s1289_s7, [#allocation4], %s1139_s13, %s1139_s13, %s1140_s14  }
 0x343   :  { %1135 = dma.done.wait [#allocation4], 1024  }
 0x344   :  { %1136 = vsyncadd [#allocation4], 4294966272 }
 0x345   :  { %609 = vsyncpa [#allocation3], 1 }
 0x346   :  { %610 = vsyncpa [#allocation6], 1 }
 0x347   :  { %611 = vsyncpa [#allocation9], 1 }
 0x348   :  { %612 = vsyncpa [#allocation4], 1 }

</bundles_post_ra>
